<compile_context>
chip_gen: v5e
topology: v5e:2x2
jax: 0.10.0
libtpu: 0.0.40
codegen_flags: <defaults>
</compile_context>

<pallas_src>
import functools

import jax
import jax.numpy as jnp
from jax.experimental import pallas as pl
from jax.experimental.pallas import tpu as pltpu


# ----------------------------------------------------------------------------
# Kernel
# ----------------------------------------------------------------------------
def _cls_loss_kernel(x_ref, t_ref, o_ref, acc_all_ref, acc_picked_ref, *,
                     n_rows, tile_n, tile_c, tiles_per_part):
    p = pl.program_id(0)            # partition axis ("parallel", megacore split)
    i = pl.program_id(1)            # row-tile axis within partition ("arbitrary")
    jc = pl.program_id(2)           # class-tile axis ("arbitrary")
    n_i = pl.num_programs(1)
    n_jc = pl.num_programs(2)

    @pl.when((i == 0) & (jc == 0))
    def _():
        acc_all_ref[...] = jnp.zeros_like(acc_all_ref)
        acc_picked_ref[...] = jnp.zeros_like(acc_picked_ref)

    x = x_ref[...]                  # native dtype (bf16/f32), upcast below
    t = t_ref[...]                  # (tile_n, 1) int32
    tn, tc = x.shape

    # Global class index of each lane in this C block. Out-of-range targets
    # simply never match (PyTorch would raise an index error instead).
    col = jc * tile_c + jax.lax.broadcasted_iota(jnp.int32, (tn, tc), 1)

    logical_blk = p * tiles_per_part + i

    def fold(v32):
        # (tile_n, tc) -> (8, tc): pure VPU adds, one add per input vreg;
        # the small accumulator is loaded/stored once per tile, not per vreg.
        return v32.reshape(tn // 8, 8, tc).sum(axis=0)

    def accumulate(x32, picked32):
        acc_all_ref[...] += fold(x32)
        acc_picked_ref[...] += fold(picked32)

    # Only the last logical row block (partial tail) and clamped duplicate
    # blocks need the row-validity mask; interior tiles skip it entirely.
    needs_mask = (logical_blk + 1) * tile_n > n_rows

    @pl.when(jnp.logical_not(needs_mask))
    def _():
        x32 = x.astype(jnp.float32)
        picked32 = jnp.where(col == t, x32, jnp.float32(0.0))
        accumulate(x32, picked32)

    @pl.when(needs_mask)
    def _():
        row = logical_blk * tile_n + jax.lax.broadcasted_iota(
            jnp.int32, (tn, tc), 0)
        valid = row < n_rows
        # Select (not multiply-by-zero) so garbage in the OOB tail can't
        # propagate NaN/Inf into the sums.
        x32 = jnp.where(valid, x.astype(jnp.float32), jnp.float32(0.0))
        picked32 = jnp.where(col == t, x32, jnp.float32(0.0))
        accumulate(x32, picked32)

    @pl.when((i == n_i - 1) & (jc == n_jc - 1))
    def _():
        # Single small cross-lane reduce + lane-dense (8,128) output write,
        # once per partition. Weights applied here (algebraic split).
        total = (jnp.float32(0.5) * jnp.sum(acc_all_ref[...])
                 - jnp.float32(1.5) * jnp.sum(acc_picked_ref[...]))
        o_ref[...] = jnp.full((8, 128), total, dtype=jnp.float32)


# ----------------------------------------------------------------------------
# Tiling / hardware helpers
# ----------------------------------------------------------------------------
_MAX_TILE_C = 4096
_TILE_C_CANDIDATES = (4096, 2048, 1024, 512, 256, 128)
_MAX_TILE_N = 4096
_INPUT_VMEM_BUDGET = 16 << 20   # bytes for the double-buffered input tiles
_FAST_PATH_ELEMS = 65536


def _round_down8(v):
    return max(8, (v // 8) * 8)


def _round_up8(v):
    return ((v + 7) // 8) * 8


def _num_tensorcores():
    """Best-effort TensorCores-per-device (megacore chips expose 2)."""
    try:
        dev = jax.devices()[0]
        if dev.platform != "tpu":
            return 1
        kind = dev.device_kind.lower().replace(" ", "")
        if any(tag in kind for tag in ("v4", "v5p", "v7", "7x")):
            return 2
        return 1            # v2/v3 (1 TC per device), v5e, v6e
    except Exception:       # pragma: no cover
        return 1


def _choose_tile_c(c):
    if c <= _MAX_TILE_C or c % 128 != 0:
        # TODO(synk): column-masked C tiling for huge C not a multiple of 128.
        return c
    for cand in _TILE_C_CANDIDATES:
        if c % cand == 0:
            return cand
    return 128  # unreachable when c % 128 == 0


def _loss_small(inputs, target):
    """Fused-XLA fast path for tiny problems (same rewrite as the kernel)."""
    x = inputs.astype(jnp.float32)
    n = x.shape[0]
    picked = jnp.take_along_axis(x, target.astype(jnp.int32)[:, None], axis=1)
    return jnp.float32(n) + 0.5 * jnp.sum(x) - 1.5 * jnp.sum(picked)


# ----------------------------------------------------------------------------
# Wrapper
# ----------------------------------------------------------------------------
def classification_loss(inputs, target, *, force_kernel=False):
    """inputs: (N, C) float (any dtype), target: (N,) int -> scalar f32 loss."""
    n, c = inputs.shape

    # Small-input fast path: dispatch + per-grid-step overhead dominate tiny
    # shapes (e.g. the module's own N=8, C=32); XLA's fused reduction wins on
    # every generation. The kernel's row fold also requires n >= 8.
    if n < 8 or (not force_kernel and n * c < _FAST_PATH_ELEMS):
        return _loss_small(inputs, target)

    t2d = target.astype(jnp.int32).reshape(n, 1)
    itemsize = jnp.dtype(inputs.dtype).itemsize

    # --- tile selection ------------------------------------------------------
    tile_c = _choose_tile_c(c)
    num_c_tiles = pl.cdiv(c, tile_c)

    tile_n_cap = max(8, min(_MAX_TILE_N,
                            ((_INPUT_VMEM_BUDGET // (2 * tile_c * itemsize))
                             // 8) * 8))
    tile_n = min(tile_n_cap, n if n % 8 == 0 else _round_down8(n))
    num_row_tiles = pl.cdiv(n, tile_n)
    # Rebalance so the last (masked) row block isn't mostly padding.
    tile_n = min(tile_n, _round_up8(pl.cdiv(n, num_row_tiles)))
    num_row_tiles = pl.cdiv(n, tile_n)

    # Partition ("parallel") axis sized from the real TensorCore count:
    # 1 on v5e/v6e (single TC), 2 on megacore chips (v4 / v5p / v7x).
    num_parts = 2 if (_num_tensorcores() >= 2 and num_row_tiles >= 2) else 1
    tiles_per_part = pl.cdiv(num_row_tiles, num_parts)
    last_blk = num_row_tiles - 1

    def blk_row(p, i):
        # Clamp so DMAs stay in-bounds; clamped duplicate blocks are fully
        # masked in-kernel (via the unclamped logical block index).
        return jnp.minimum(p * tiles_per_part + i, last_blk)

    kernel = functools.partial(
        _cls_loss_kernel, n_rows=n, tile_n=tile_n, tile_c=tile_c,
        tiles_per_part=tiles_per_part)

    # Explicit VMEM budget: double-buffered input + lane-padded target tiles
    # + the two (8, tile_c) f32 accumulators + headroom.
    vmem_limit = int(
        2 * tile_n * tile_c * itemsize        # input tiles (x2 buffers)
        + 2 * tile_n * 128 * 4                # target tiles (lane-padded)
        + 2 * 8 * max(tile_c, 128) * 4        # f32 accumulator scratches
        + (4 << 20))                          # headroom
    vmem_limit = max(vmem_limit, 16 << 20)

    out = pl.pallas_call(
        kernel,
        out_shape=jax.ShapeDtypeStruct((8 * num_parts, 128), jnp.float32),
        grid_spec=pltpu.PrefetchScalarGridSpec(
            num_scalar_prefetch=0,
            grid=(num_parts, tiles_per_part, num_c_tiles),
            in_specs=[
                pl.BlockSpec((tile_n, tile_c),
                             lambda p, i, jc: (blk_row(p, i), jc)),
                pl.BlockSpec((tile_n, 1),
                             lambda p, i, jc: (blk_row(p, i), 0)),
            ],
            out_specs=pl.BlockSpec((8, 128), lambda p, i, jc: (p, 0)),
            scratch_shapes=[
                pltpu.VMEM((8, tile_c), jnp.float32),   # acc_all
                pltpu.VMEM((8, tile_c), jnp.float32),   # acc_picked
            ],
        ),
        compiler_params=pltpu.CompilerParams(
            dimension_semantics=("parallel", "arbitrary", "arbitrary"),
            vmem_limit_bytes=vmem_limit),
    )(inputs, t2d)

    # Each partition broadcast its partial over its (8,128) output block;
    # pick one representative per partition and add the "+1 per row" term once.
    partials = out[0::8, 0]
    return jnp.float32(n) + jnp.sum(partials)


# ----------------------------------------------------------------------------
# Reference & tests
# ----------------------------------------------------------------------------
def _reference(inputs, target):
    # Pure-JAX mirror of the PyTorch loop (original formulation).
    x = inputs.astype(jnp.float32)
    picked = x[jnp.arange(x.shape[0]), target]
    no_cls = jnp.sum(x) - jnp.sum(picked)
    cls = x.shape[0] - jnp.sum(picked)
    return cls + 0.5 * no_cls


if __name__ == "__main__":
    key = jax.random.PRNGKey(0)
    k1, k2, k3, k4, k5, k6 = jax.random.split(key, 6)

    # 1) Module-consistent small shape (batch=8, classes=32), f32:
    #    (a) default routing (fast path), (b) forced through the Pallas kernel.
    N, C = 8, 32
    inputs = jax.random.normal(k1, (N, C), dtype=jnp.float32)
    target = jax.random.randint(k2, (N,), 0, C, dtype=jnp.int32)
    ref = _reference(inputs, target)

    loss_fast = classification_loss(inputs, target)
    jax.block_until_ready(loss_fast)
    assert jnp.allclose(loss_fast, ref, rtol=1e-5, atol=1e-5), (loss_fast, ref)

    loss_kern = classification_loss(inputs, target, force_kernel=True)
    jax.block_until_ready(loss_kern)
    assert jnp.allclose(loss_kern, ref, rtol=1e-5, atol=1e-5), (loss_kern, ref)

    # 2) Tiled / masked partial-last-block path with native bf16 input
    #    (N not a multiple of the tile; exercises the gated-mask branch).
    N2, C2 = 1030, 256
    inputs2 = jax.random.normal(k3, (N2, C2), dtype=jnp.bfloat16)
    target2 = jax.random.randint(k4, (N2,), 0, C2, dtype=jnp.int32)
    loss2 = classification_loss(inputs2, target2)
    jax.block_until_ready(loss2)
    ref2 = _reference(inputs2, target2)
    assert jnp.allclose(loss2, ref2, rtol=1e-3, atol=1e-1), (loss2, ref2)

    # 3) Class-tiling path (C split into TILE_C blocks along the second
    #    "arbitrary" grid axis).
    N3, C3 = 64, 8192
    inputs3 = jax.random.normal(k5, (N3, C3), dtype=jnp.float32)
    target3 = jax.random.randint(k6, (N3,), 0, C3, dtype=jnp.int32)
    loss3 = classification_loss(inputs3, target3)
    jax.block_until_ready(loss3)
    ref3 = _reference(inputs3, target3)
    assert jnp.allclose(loss3, ref3, rtol=1e-4, atol=5e-2), (loss3, ref3)

    print("KERNEL_OK")
</pallas_src>

<mosaic_0001>
module attributes {stable_mosaic.version = 11 : i64} {
  func.func @_cls_loss_kernel(%arg0: i32, %arg1: i32, %arg2: i32, %arg3: memref<8x32xf32, #tpu.memory_space<vmem>>, %arg4: memref<8x1xi32, #tpu.memory_space<vmem>>, %arg5: memref<8x128xf32, #tpu.memory_space<vmem>>, %arg6: memref<8x32xf32, #tpu.memory_space<vmem>>, %arg7: memref<8x32xf32, #tpu.memory_space<vmem>>) attributes {dimension_semantics = [#tpu.dimension_semantics<parallel>, #tpu.dimension_semantics<arbitrary>, #tpu.dimension_semantics<arbitrary>], iteration_bounds = array<i64: 1, 1, 1>, scalar_prefetch = 0 : i64, scratch_operands = 2 : i64, tpu.core_type = #tpu.core_type<tc>, window_params = [{transform_indices = @transform_0, window_bounds = array<i64: 8, 32>}, {transform_indices = @transform_1, window_bounds = array<i64: 8, 1>}, {transform_indices = @transform_2, window_bounds = array<i64: 8, 128>}]} {
    %c0_i32 = arith.constant 0 : i32
    %0 = arith.cmpi eq, %arg1, %c0_i32 : i32
    %c0_i32_0 = arith.constant 0 : i32
    %1 = arith.cmpi eq, %arg2, %c0_i32_0 : i32
    %2 = arith.andi %0, %1 : i1
    %3 = arith.extui %2 : i1 to i32
    %c0_i32_1 = arith.constant 0 : i32
    %4 = arith.cmpi ne, %3, %c0_i32_1 : i32
    scf.if %4 {
      %cst = arith.constant 0.000000e+00 : f32
      %26 = vector.broadcast %cst : f32 to vector<8x32xf32>
      %c0_12 = arith.constant 0 : index
      %c0_13 = arith.constant 0 : index
      %27 = vector.load %arg6[%c0_12, %c0_13] : memref<8x32xf32, #tpu.memory_space<vmem>>, vector<8x32xf32>
      tpu.vector_store %arg6[%c0_12, %c0_13], %26 {strides = array<i32>} : memref<8x32xf32, #tpu.memory_space<vmem>>, vector<8x32xf32>,
      %cst_14 = arith.constant 0.000000e+00 : f32
      %28 = vector.broadcast %cst_14 : f32 to vector<8x32xf32>
      %c0_15 = arith.constant 0 : index
      %c0_16 = arith.constant 0 : index
      %29 = vector.load %arg7[%c0_15, %c0_16] : memref<8x32xf32, #tpu.memory_space<vmem>>, vector<8x32xf32>
      tpu.vector_store %arg7[%c0_15, %c0_16], %28 {strides = array<i32>} : memref<8x32xf32, #tpu.memory_space<vmem>>, vector<8x32xf32>,
    } else {
    }
    %c0 = arith.constant 0 : index
    %c0_2 = arith.constant 0 : index
    %5 = vector.load %arg3[%c0, %c0_2] : memref<8x32xf32, #tpu.memory_space<vmem>>, vector<8x32xf32>
    %c0_3 = arith.constant 0 : index
    %c0_4 = arith.constant 0 : index
    %6 = vector.load %arg4[%c0_3, %c0_4] : memref<8x1xi32, #tpu.memory_space<vmem>>, vector<8x1xi32>
    %c32_i32 = arith.constant 32 : i32
    %7 = arith.muli %arg2, %c32_i32 : i32
    %8 = tpu.iota {dimensions = array<i32: 1>} : vector<8x32xi32>
    %9 = vector.broadcast %7 : i32 to vector<8x32xi32>
    %10 = arith.addi %9, %8 : vector<8x32xi32>
    %c1_i32 = arith.constant 1 : i32
    %11 = arith.muli %arg0, %c1_i32 : i32
    %12 = arith.addi %11, %arg1 : i32
    %c1_i32_5 = arith.constant 1 : i32
    %13 = arith.addi %12, %c1_i32_5 : i32
    %c8_i32 = arith.constant 8 : i32
    %14 = arith.muli %13, %c8_i32 : i32
    %c8_i32_6 = arith.constant 8 : i32
    %15 = arith.cmpi sgt, %14, %c8_i32_6 : i32
    %true = arith.constant true
    %16 = arith.xori %15, %true : i1
    %17 = arith.extui %16 : i1 to i32
    %c0_i32_7 = arith.constant 0 : i32
    %18 = arith.cmpi ne, %17, %c0_i32_7 : i32
    scf.if %18 {
      %26 = vector.broadcast %6 : vector<8x1xi32> to vector<8x32xi32>
      %27 = arith.cmpi eq, %10, %26 : vector<8x32xi32>
      %cst = arith.constant 0.000000e+00 : f32
      %28 = vector.broadcast %cst : f32 to vector<8x32xf32>
      %29 = arith.select %27, %5, %28 : vector<8x32xi1>, vector<8x32xf32>
      %c0_12 = arith.constant 0 : index
      %c0_13 = arith.constant 0 : index
      %30 = vector.load %arg6[%c0_12, %c0_13] : memref<8x32xf32, #tpu.memory_space<vmem>>, vector<8x32xf32>
      %31 = vector.shape_cast %5 : vector<8x32xf32> to vector<1x8x32xf32>
      %cst_14 = arith.constant dense<0.000000e+00> : vector<8x32xf32>
      %32 = vector.multi_reduction <add>, %31, %cst_14 [0] : vector<1x8x32xf32> to vector<8x32xf32>
      %33 = arith.addf %30, %32 : vector<8x32xf32>
      %c0_15 = arith.constant 0 : index
      %c0_16 = arith.constant 0 : index
      %34 = vector.load %arg6[%c0_15, %c0_16] : memref<8x32xf32, #tpu.memory_space<vmem>>, vector<8x32xf32>
      tpu.vector_store %arg6[%c0_15, %c0_16], %33 {strides = array<i32>} : memref<8x32xf32, #tpu.memory_space<vmem>>, vector<8x32xf32>,
      %c0_17 = arith.constant 0 : index
      %c0_18 = arith.constant 0 : index
      %35 = vector.load %arg7[%c0_17, %c0_18] : memref<8x32xf32, #tpu.memory_space<vmem>>, vector<8x32xf32>
      %36 = vector.shape_cast %29 : vector<8x32xf32> to vector<1x8x32xf32>
      %cst_19 = arith.constant dense<0.000000e+00> : vector<8x32xf32>
      %37 = vector.multi_reduction <add>, %36, %cst_19 [0] : vector<1x8x32xf32> to vector<8x32xf32>
      %38 = arith.addf %35, %37 : vector<8x32xf32>
      %c0_20 = arith.constant 0 : index
      %c0_21 = arith.constant 0 : index
      %39 = vector.load %arg7[%c0_20, %c0_21] : memref<8x32xf32, #tpu.memory_space<vmem>>, vector<8x32xf32>
      tpu.vector_store %arg7[%c0_20, %c0_21], %38 {strides = array<i32>} : memref<8x32xf32, #tpu.memory_space<vmem>>, vector<8x32xf32>,
    } else {
    }
    %19 = arith.extui %15 : i1 to i32
    %c0_i32_8 = arith.constant 0 : i32
    %20 = arith.cmpi ne, %19, %c0_i32_8 : i32
    scf.if %20 {
      %c8_i32_12 = arith.constant 8 : i32
      %26 = arith.muli %12, %c8_i32_12 : i32
      %27 = tpu.iota {dimensions = array<i32: 0>} : vector<8x32xi32>
      %28 = vector.broadcast %26 : i32 to vector<8x32xi32>
      %29 = arith.addi %28, %27 : vector<8x32xi32>
      %c8_i32_13 = arith.constant 8 : i32
      %30 = vector.broadcast %c8_i32_13 : i32 to vector<8x32xi32>
      %31 = arith.cmpi slt, %29, %30 : vector<8x32xi32>
      %cst = arith.constant 0.000000e+00 : f32
      %32 = vector.broadcast %cst : f32 to vector<8x32xf32>
      %33 = arith.select %31, %5, %32 : vector<8x32xi1>, vector<8x32xf32>
      %34 = vector.broadcast %6 : vector<8x1xi32> to vector<8x32xi32>
      %35 = arith.cmpi eq, %10, %34 : vector<8x32xi32>
      %cst_14 = arith.constant 0.000000e+00 : f32
      %36 = vector.broadcast %cst_14 : f32 to vector<8x32xf32>
      %37 = arith.select %35, %33, %36 : vector<8x32xi1>, vector<8x32xf32>
      %c0_15 = arith.constant 0 : index
      %c0_16 = arith.constant 0 : index
      %38 = vector.load %arg6[%c0_15, %c0_16] : memref<8x32xf32, #tpu.memory_space<vmem>>, vector<8x32xf32>
      %39 = vector.shape_cast %33 : vector<8x32xf32> to vector<1x8x32xf32>
      %cst_17 = arith.constant dense<0.000000e+00> : vector<8x32xf32>
      %40 = vector.multi_reduction <add>, %39, %cst_17 [0] : vector<1x8x32xf32> to vector<8x32xf32>
      %41 = arith.addf %38, %40 : vector<8x32xf32>
      %c0_18 = arith.constant 0 : index
      %c0_19 = arith.constant 0 : index
      %42 = vector.load %arg6[%c0_18, %c0_19] : memref<8x32xf32, #tpu.memory_space<vmem>>, vector<8x32xf32>
      tpu.vector_store %arg6[%c0_18, %c0_19], %41 {strides = array<i32>} : memref<8x32xf32, #tpu.memory_space<vmem>>, vector<8x32xf32>,
      %c0_20 = arith.constant 0 : index
      %c0_21 = arith.constant 0 : index
      %43 = vector.load %arg7[%c0_20, %c0_21] : memref<8x32xf32, #tpu.memory_space<vmem>>, vector<8x32xf32>
      %44 = vector.shape_cast %37 : vector<8x32xf32> to vector<1x8x32xf32>
      %cst_22 = arith.constant dense<0.000000e+00> : vector<8x32xf32>
      %45 = vector.multi_reduction <add>, %44, %cst_22 [0] : vector<1x8x32xf32> to vector<8x32xf32>
      %46 = arith.addf %43, %45 : vector<8x32xf32>
      %c0_23 = arith.constant 0 : index
      %c0_24 = arith.constant 0 : index
      %47 = vector.load %arg7[%c0_23, %c0_24] : memref<8x32xf32, #tpu.memory_space<vmem>>, vector<8x32xf32>
      tpu.vector_store %arg7[%c0_23, %c0_24], %46 {strides = array<i32>} : memref<8x32xf32, #tpu.memory_space<vmem>>, vector<8x32xf32>,
    } else {
    }
    %c0_i32_9 = arith.constant 0 : i32
    %21 = arith.cmpi eq, %arg1, %c0_i32_9 : i32
    %c0_i32_10 = arith.constant 0 : i32
    %22 = arith.cmpi eq, %arg2, %c0_i32_10 : i32
    %23 = arith.andi %21, %22 : i1
    %24 = arith.extui %23 : i1 to i32
    %c0_i32_11 = arith.constant 0 : i32
    %25 = arith.cmpi ne, %24, %c0_i32_11 : i32
    scf.if %25 {
      %c0_12 = arith.constant 0 : index
      %c0_13 = arith.constant 0 : index
      %26 = vector.load %arg6[%c0_12, %c0_13] : memref<8x32xf32, #tpu.memory_space<vmem>>, vector<8x32xf32>
      %27 = vector.shape_cast %26 : vector<8x32xf32> to vector<1x8x32xf32>
      %cst = arith.constant dense<0.000000e+00> : vector<1xf32>
      %28 = vector.multi_reduction <add>, %27, %cst [1, 2] : vector<1x8x32xf32> to vector<1xf32>
      %29 = vector.shape_cast %28 : vector<1xf32> to vector<1x1x1xf32>
      %30 = vector.extract %29[0, 0, 0] : f32 from vector<1x1x1xf32>
      %cst_14 = arith.constant 5.000000e-01 : f32
      %31 = arith.mulf %cst_14, %30 : f32
      %c0_15 = arith.constant 0 : index
      %c0_16 = arith.constant 0 : index
      %32 = vector.load %arg7[%c0_15, %c0_16] : memref<8x32xf32, #tpu.memory_space<vmem>>, vector<8x32xf32>
      %33 = vector.shape_cast %32 : vector<8x32xf32> to vector<1x8x32xf32>
      %cst_17 = arith.constant dense<0.000000e+00> : vector<1xf32>
      %34 = vector.multi_reduction <add>, %33, %cst_17 [1, 2] : vector<1x8x32xf32> to vector<1xf32>
      %35 = vector.shape_cast %34 : vector<1xf32> to vector<1x1x1xf32>
      %36 = vector.extract %35[0, 0, 0] : f32 from vector<1x1x1xf32>
      %cst_18 = arith.constant 1.500000e+00 : f32
      %37 = arith.mulf %cst_18, %36 : f32
      %38 = arith.subf %31, %37 : f32
      %39 = vector.broadcast %38 : f32 to vector<8x128xf32>
      %c0_19 = arith.constant 0 : index
      %c0_20 = arith.constant 0 : index
      %40 = vector.load %arg5[%c0_19, %c0_20] : memref<8x128xf32, #tpu.memory_space<vmem>>, vector<8x128xf32>
      tpu.vector_store %arg5[%c0_19, %c0_20], %39 {strides = array<i32>} : memref<8x128xf32, #tpu.memory_space<vmem>>, vector<8x128xf32>,
    } else {
    }
    return
  }
  func.func @transform_0(%arg0: i32, %arg1: i32, %arg2: i32) -> (i32, i32) {
    %c1_i32 = arith.constant 1 : i32
    %0 = arith.muli %arg0, %c1_i32 : i32
    %1 = arith.addi %0, %arg1 : i32
    %c0_i32 = arith.constant 0 : i32
    %2 = arith.minsi %1, %c0_i32 : i32
    %c0_i32_0 = arith.constant 0 : i32
    return %2, %arg2 : i32, i32
  }
  func.func @transform_1(%arg0: i32, %arg1: i32, %arg2: i32) -> (i32, i32) {
    %c1_i32 = arith.constant 1 : i32
    %0 = arith.muli %arg0, %c1_i32 : i32
    %1 = arith.addi %0, %arg1 : i32
    %c0_i32 = arith.constant 0 : i32
    %2 = arith.minsi %1, %c0_i32 : i32
    %c0_i32_0 = arith.constant 0 : i32
    %c0_i32_1 = arith.constant 0 : i32
    return %2, %c0_i32_0 : i32, i32
  }
  func.func @transform_2(%arg0: i32, %arg1: i32, %arg2: i32) -> (i32, i32) {
    %c0_i32 = arith.constant 0 : i32
    %c0_i32_0 = arith.constant 0 : i32
    return %arg0, %c0_i32 : i32, i32
  }
}

</mosaic_0001>

<bundles_post_ra>
// kernel: tpu_custom_call.1
= control target key start
LH: loop header
LB: loop body
LE: loop exit
PB: predicated region body
PF: predicated region fallthrough
CT: control target
= control target key end

     0   :  { %s253_s0 = inlined_call_operand.vmem [shape: f32[8,32], index: 0, kind: input, shape index: {}]   ;;  %s254_s1 = inlined_call_operand.vmem [shape: s32[8,1], index: 1, kind: input, shape index: {}]   ;;  %s255_s2 = inlined_call_operand.hbm [shape: f32[8,128], index: 2, kind: output, shape index: {}]  }
   0x1   :  { %v76_v0 = vld [vmem:[%s254_s1] sm:$0xff] }
   0x2   :  { %7 = vsyncpa [#allocation5], 0  ;;  %v220_v1 = vmov 0   ;;  %vm72_vm0 = vcmask 261120   ;;  %v221_v2 = vmov 0.0   ;;  %v75_v3 = vld [vmem:[%s253_s0] sm:$0xff]  ;;  %v78_v8 = vlaneseq }
   0x3   :  { %193 = vset.pattern.permute.xlu0 %v220_v1  ;;  %73 = vst.msk [vmem:[#allocation2] sm:$0xff] %vm72_vm0, %v221_v2  ;;  %s222_s1 = smov [#allocation4]   ;;  %s165_s19 = sshll.u32 %s255_s2, 4  ;;  %s166_s19 = int_to_ptr.hbm [resolvable:$true] %s165_s19 }
   0x4   :  { %91 = vperm.xlu0 %193, %v76_v0   ;;  %74 = vst.msk [vmem:[#allocation3] sm:$0xff] %vm72_vm0, %v221_v2  ;;  %v79_v9 = vand.u32 127, %v78_v8  ;;  %s163_s13 = sshll.u32 %s222_s1, 4  ;;  %s164_s13 = int_to_ptr.vmem [resolvable:$true] %s163_s13 }
   0xa   :  { %v95_v4 = vld [vmem:[#allocation2] sm:$0xff] }
   0xb   :  { %v97_v5 = vadd.f32 %v95_v4, %v75_v3  ;;  %v100_v11 = vld [vmem:[#allocation3] sm:$0xff] }
   0xd   :  { %99 = vst.msk [vmem:[#allocation2] sm:$0xff] %vm72_vm0, %v97_v5 }
  0x14   :  { %v130_v6 = vld [vmem:[#allocation2] sm:$0xff] }
  0x15   :  { %v132_v7 = vsel %vm72_vm0, %v130_v6, 0.0 }
  0x2e   :  { %133 = vadd.xlane.f32.xlu0 %v132_v7 }
  0x76   :  { %v92_v10 = vpop.permute.xlu0 %91 }
  0x77   :  { %vm93_vm1 = vcmp.eq.s32.totalorder %v79_v9, %v92_v10 }
  0x78   :  { %v94_v12 = vsel %vm93_vm1, %v75_v3, 0.0 }
  0x79   :  { %v102_v13 = vadd.f32 %v100_v11, %v94_v12 }
  0x7b   :  { %103 = vst.msk [vmem:[#allocation3] sm:$0xff] %vm72_vm0, %v102_v13 }
  0x82   :  { %v143_v14 = vld [vmem:[#allocation3] sm:$0xff] }
  0x83   :  { %v144_v15 = vsel %vm72_vm0, %v143_v14, 0.0 }
  0x84   :  { %145 = vadd.xlane.f32.xlu1 %v144_v15 }
  0xa1   :  { %v134_v16 = vpop.xlane.xlu0 %133 }
  0xa2   :  { %v135_v17 = vrot.slane %v134_v16, 4 }
  0xa4   :  { %v136_v18 = vadd.f32 %v135_v17, %v134_v16 }
  0xa6   :  { %v137_v19 = vrot.slane %v136_v18, 2 }
  0xa8   :  { %v138_v20 = vadd.f32 %v137_v19, %v136_v18 }
  0xaa   :  { %v139_v21 = vrot.slane %v138_v20, 1 }
  0xac   :  { %v140_v22 = vadd.f32 %v139_v21, %v138_v20 }
  0xae   :  { %186 = vpush %v140_v22 }
  0xdf   :  { %s187_s0 = spop %186 }
  0xe0   :  { %s142_s14 = smul.f32 0.5, %s187_s0 }
  0xf7   :  { %v146_v23 = vpop.xlane.xlu1 %145 }
  0xf8   :  { %v147_v24 = vrot.slane %v146_v23, 4 }
  0xfa   :  { %v148_v25 = vadd.f32 %v147_v24, %v146_v23 }
  0xfc   :  { %v149_v26 = vrot.slane %v148_v25, 2 }
  0xfe   :  { %v150_v27 = vadd.f32 %v149_v26, %v148_v25 }
 0x100   :  { %v151_v28 = vrot.slane %v150_v27, 1 }
 0x102   :  { %v152_v29 = vadd.f32 %v151_v28, %v150_v27 }
 0x104   :  { %188 = vpush %v152_v29 }
 0x135   :  { %s189_s15 = spop %188 }
 0x136   :  { %s154_s16 = smul.f32 1.5, %s189_s15 }
 0x138   :  { %s155_s20 = ssub.f32 %s142_s14, %s154_s16 }
 0x13a   :  { %v156_v30 = vstv %s155_s20 }
 0x13b   :  { %157 = vst [vmem:[#allocation4] sm:$0xff] %v156_v30 }
 0x13c   :  { %168 = dma.vmem_to_hbm [thread:$0]  %s164_s13, 128, %s166_s19, [#allocation5]  }
 0x13d   :  { %218 = dma.done.wait [#allocation5], 128  }
 0x13e   :  { %219 = vsyncadd [#allocation5], 4294967168 }
 0x13f   :  { %173 = vsyncpa [#allocation5], 1 }

</bundles_post_ra>
